<compile_context>
chip_gen: v7x
topology: tpu7x:2x2x1
jax: 0.10.0
libtpu: 0.0.40
codegen_flags: <defaults>
</compile_context>

<pallas_src>
import functools

import jax
import jax.numpy as jnp
from jax.experimental import pallas as pl
from jax.experimental.pallas import tpu as pltpu

EMBEDDING_DIM = 128

# Embedding tables up to this many bytes stay VMEM-resident (fast path).
_RESIDENT_TABLE_MAX_BYTES = 24 << 20
# Max in-flight row-gather DMAs on the HBM fallback path.
_DMA_WINDOW = 32


def _pick_s_tile(S):
    """Sequence rows per grid step (multiple of 8, or the full sequence)."""
    if S <= 512:
        return S
    for t in (512, 384, 256, 128, 64, 32, 16, 8):
        if S % t == 0:
            return t
    return S  # ragged sequence: one whole-sequence tile per batch element


def _gather_resident_kernel(ids_ref, table_ref, pos_ref, out_ref, *, seq_len, s_tile):
    # ids_ref:   (B*S,)        int32   SMEM (scalar prefetch)
    # table_ref: (V, D)        VMEM    resident (fetched once)
    # pos_ref:   (MAX_SEQ, D)  VMEM    resident (fetched once)
    # out_ref:   (S_TILE, D)   VMEM    (batch dim squeezed away)
    b = pl.program_id(0)
    st = pl.program_id(1)
    base = b * seq_len + st * s_tile

    # Row gather at VMEM speed: dynamic-slice load per token, store into the
    # output block.  s_tile is static -> loop unrolls at trace time.
    for r in range(s_tile):
        tok = ids_ref[base + r]                       # scalar read from SMEM
        out_ref[pl.ds(r, 1), :] = table_ref[pl.ds(tok, 1), :].astype(out_ref.dtype)

    pos_start = st * s_tile
    if s_tile % 8 == 0:
        pos_start = pl.multiple_of(pos_start, 8)
    out_ref[...] = out_ref[...] + pos_ref[pl.ds(pos_start, s_tile), :].astype(out_ref.dtype)


def _gather_hbm_kernel(ids_ref, table_hbm, pos_ref, out_ref, sems, *, seq_len, s_tile):
    # table_hbm: (V, D) ref left in HBM (memory_space=pl.ANY); rows are DMA'd
    # directly into the output block with a rolling window of outstanding copies.
    b = pl.program_id(0)
    st = pl.program_id(1)
    base = b * seq_len + st * s_tile
    w = sems.shape[0]

    # Read every token id of this tile from SMEM before any DMA wait
    # (.wait() breaks SMEM sst->sld forwarding).
    toks = [ids_ref[base + r] for r in range(s_tile)]

    def row_copy(r):
        return pltpu.make_async_copy(
            table_hbm.at[pl.ds(toks[r], 1), :],       # (1, D) row of the table
            out_ref.at[pl.ds(r, 1), :],               # (1, D) row of the output tile
            sems.at[r % w])

    for r in range(min(w, s_tile)):                   # prime the window
        row_copy(r).start()
    for r in range(s_tile):
        row_copy(r).wait()
        if r + w < s_tile:                            # keep the window full
            row_copy(r + w).start()

    pos_start = st * s_tile
    if s_tile % 8 == 0:
        pos_start = pl.multiple_of(pos_start, 8)
    out_ref[...] = out_ref[...] + pos_ref[pl.ds(pos_start, s_tile), :].astype(out_ref.dtype)


def input_embedding(token_ids, emb_table, pos_table,
                    *, resident_table_max_bytes=_RESIDENT_TABLE_MAX_BYTES):
    """Pallas equivalent of Input_embedding.forward(token_input_ids)."""
    B, S = token_ids.shape
    V, D = emb_table.shape
    MAX_SEQ, D_pos = pos_table.shape
    assert D == EMBEDDING_DIM and D_pos == D
    assert S <= MAX_SEQ

    s_tile = _pick_s_tile(S)
    n_s = S // s_tile

    out_dtype = emb_table.dtype
    itemsize = jnp.dtype(out_dtype).itemsize
    table_bytes = V * D * itemsize
    resident = table_bytes <= resident_table_max_bytes

    # Flatten ids to 1D (tighter SMEM packing) and clamp to [0, V) so a bad id
    # can never drive an out-of-bounds gather / HBM DMA.
    ids_flat = jnp.clip(token_ids.reshape(-1).astype(jnp.int32), 0, V - 1)

    # Positional table: tiny, keep fully resident (constant block index ->
    # DMA'd once, never re-fetched across the grid).
    pos_spec = pl.BlockSpec((MAX_SEQ, D), lambda b, st, ids: (0, 0))
    out_spec = pl.BlockSpec((pl.Squeezed(), s_tile, D), lambda b, st, ids: (b, st, 0))

    if resident:
        kernel = functools.partial(_gather_resident_kernel, seq_len=S, s_tile=s_tile)
        table_spec = pl.BlockSpec((V, D), lambda b, st, ids: (0, 0))   # VMEM resident
        scratch_shapes = []
        pos_bytes = MAX_SEQ * D * jnp.dtype(pos_table.dtype).itemsize
        out_tile_bytes = s_tile * D * itemsize
        vmem_limit = int(table_bytes + pos_bytes + 8 * out_tile_bytes + (2 << 20))
        vmem_limit = max(vmem_limit, 16 << 20)         # don't go below v5e default
    else:
        kernel = functools.partial(_gather_hbm_kernel, seq_len=S, s_tile=s_tile)
        table_spec = pl.BlockSpec(memory_space=pl.ANY)                 # stays in HBM
        scratch_shapes = [pltpu.SemaphoreType.DMA((min(_DMA_WINDOW, s_tile),))]
        vmem_limit = None

    grid_spec = pltpu.PrefetchScalarGridSpec(
        num_scalar_prefetch=1,                          # token ids -> SMEM
        grid=(B, n_s),
        in_specs=[table_spec, pos_spec],
        out_specs=out_spec,
        scratch_shapes=scratch_shapes,
    )

    return pl.pallas_call(
        kernel,
        out_shape=jax.ShapeDtypeStruct((B, S, D), out_dtype),
        grid_spec=grid_spec,
        compiler_params=pltpu.CompilerParams(
            dimension_semantics=("parallel", "parallel"),
            vmem_limit_bytes=vmem_limit),
    )(ids_flat, emb_table, pos_table)


if __name__ == "__main__":
    VOCAB_SIZE = 64
    MAX_SEQ_LENGTH = 16
    BATCH = 2
    SEQ = 8

    key = jax.random.PRNGKey(0)
    k_emb, k_pos, k_ids = jax.random.split(key, 3)

    # nn.Embedding default init ~ N(0, 1); deterministic synthetic weights.
    emb_table = jax.random.normal(k_emb, (VOCAB_SIZE, EMBEDDING_DIM), jnp.float32)
    pos_table = jax.random.normal(k_pos, (MAX_SEQ_LENGTH, EMBEDDING_DIM), jnp.float32)
    token_ids = jax.random.randint(k_ids, (BATCH, SEQ), 0, VOCAB_SIZE, jnp.int32)

    # Pure-JAX reference of the PyTorch forward.
    ref = emb_table[token_ids] + pos_table[None, :SEQ, :]

    # Fast path: VMEM-resident embedding table (default for this vocab size).
    out_fast = jax.block_until_ready(input_embedding(token_ids, emb_table, pos_table))
    assert out_fast.shape == (BATCH, SEQ, EMBEDDING_DIM)
    assert jnp.allclose(out_fast, ref, atol=1e-5), "resident-table path mismatch"

    # Large-vocab fallback: force the HBM rolling-window gather path too.
    out_hbm = jax.block_until_ready(
        input_embedding(token_ids, emb_table, pos_table, resident_table_max_bytes=0))
    assert jnp.allclose(out_hbm, ref, atol=1e-5), "HBM-gather path mismatch"

    print("KERNEL_OK")
</pallas_src>

<mosaic_0001>
module attributes {stable_mosaic.version = 11 : i64} {
  func.func @_gather_resident_kernel(%arg0: i32, %arg1: i32, %arg2: memref<16xi32, #tpu.memory_space<smem>>, %arg3: memref<64x128xf32, #tpu.memory_space<vmem>>, %arg4: memref<16x128xf32, #tpu.memory_space<vmem>>, %arg5: memref<1x8x128xf32, #tpu.memory_space<vmem>>) attributes {dimension_semantics = [#tpu.dimension_semantics<parallel>, #tpu.dimension_semantics<parallel>], iteration_bounds = array<i64: 2, 1>, scalar_prefetch = 1 : i64, scratch_operands = 0 : i64, tpu.core_type = #tpu.core_type<tc>, window_params = [{pipeline_mode = #tpu.pipeline_mode<synchronous>, transform_indices = @transform_0, window_bounds = array<i64: 64, 128>}, {pipeline_mode = #tpu.pipeline_mode<synchronous>, transform_indices = @transform_1, window_bounds = array<i64: 16, 128>}, {transform_indices = @transform_2, window_bounds = array<i64: 1, 8, 128>}]} {
    %c8_i32 = arith.constant 8 : i32
    %0 = arith.muli %arg0, %c8_i32 : i32
    %c8_i32_0 = arith.constant 8 : i32
    %1 = arith.muli %arg1, %c8_i32_0 : i32
    %2 = arith.addi %0, %1 : i32
    %c0_i32 = arith.constant 0 : i32
    %3 = arith.addi %2, %c0_i32 : i32
    %4 = arith.index_cast %3 : i32 to index
    %5 = memref.load %arg2[%4] : memref<16xi32, #tpu.memory_space<smem>>
    %6 = arith.index_cast %5 : i32 to index
    %c0 = arith.constant 0 : index
    %7 = vector.load %arg3[%6, %c0] : memref<64x128xf32, #tpu.memory_space<vmem>>, vector<1x128xf32>
    %c0_1 = arith.constant 0 : index
    %c0_2 = arith.constant 0 : index
    %c0_3 = arith.constant 0 : index
    %8 = vector.load %arg5[%c0_1, %c0_2, %c0_3] : memref<1x8x128xf32, #tpu.memory_space<vmem>>, vector<1x1x128xf32>
    %9 = vector.shape_cast %8 : vector<1x1x128xf32> to vector<1x128xf32>
    %10 = vector.shape_cast %7 : vector<1x128xf32> to vector<1x1x128xf32>
    tpu.vector_store %arg5[%c0_1, %c0_2, %c0_3], %10 {strides = array<i32>} : memref<1x8x128xf32, #tpu.memory_space<vmem>>, vector<1x1x128xf32>,
    %c1_i32 = arith.constant 1 : i32
    %11 = arith.addi %2, %c1_i32 : i32
    %12 = arith.index_cast %11 : i32 to index
    %13 = memref.load %arg2[%12] : memref<16xi32, #tpu.memory_space<smem>>
    %14 = arith.index_cast %13 : i32 to index
    %c0_4 = arith.constant 0 : index
    %15 = vector.load %arg3[%14, %c0_4] : memref<64x128xf32, #tpu.memory_space<vmem>>, vector<1x128xf32>
    %c0_5 = arith.constant 0 : index
    %c1 = arith.constant 1 : index
    %c0_6 = arith.constant 0 : index
    %16 = vector.load %arg5[%c0_5, %c1, %c0_6] : memref<1x8x128xf32, #tpu.memory_space<vmem>>, vector<1x1x128xf32>
    %17 = vector.shape_cast %16 : vector<1x1x128xf32> to vector<1x128xf32>
    %18 = vector.shape_cast %15 : vector<1x128xf32> to vector<1x1x128xf32>
    tpu.vector_store %arg5[%c0_5, %c1, %c0_6], %18 {strides = array<i32>} : memref<1x8x128xf32, #tpu.memory_space<vmem>>, vector<1x1x128xf32>,
    %c2_i32 = arith.constant 2 : i32
    %19 = arith.addi %2, %c2_i32 : i32
    %20 = arith.index_cast %19 : i32 to index
    %21 = memref.load %arg2[%20] : memref<16xi32, #tpu.memory_space<smem>>
    %22 = arith.index_cast %21 : i32 to index
    %c0_7 = arith.constant 0 : index
    %23 = vector.load %arg3[%22, %c0_7] : memref<64x128xf32, #tpu.memory_space<vmem>>, vector<1x128xf32>
    %c0_8 = arith.constant 0 : index
    %c2 = arith.constant 2 : index
    %c0_9 = arith.constant 0 : index
    %24 = vector.load %arg5[%c0_8, %c2, %c0_9] : memref<1x8x128xf32, #tpu.memory_space<vmem>>, vector<1x1x128xf32>
    %25 = vector.shape_cast %24 : vector<1x1x128xf32> to vector<1x128xf32>
    %26 = vector.shape_cast %23 : vector<1x128xf32> to vector<1x1x128xf32>
    tpu.vector_store %arg5[%c0_8, %c2, %c0_9], %26 {strides = array<i32>} : memref<1x8x128xf32, #tpu.memory_space<vmem>>, vector<1x1x128xf32>,
    %c3_i32 = arith.constant 3 : i32
    %27 = arith.addi %2, %c3_i32 : i32
    %28 = arith.index_cast %27 : i32 to index
    %29 = memref.load %arg2[%28] : memref<16xi32, #tpu.memory_space<smem>>
    %30 = arith.index_cast %29 : i32 to index
    %c0_10 = arith.constant 0 : index
    %31 = vector.load %arg3[%30, %c0_10] : memref<64x128xf32, #tpu.memory_space<vmem>>, vector<1x128xf32>
    %c0_11 = arith.constant 0 : index
    %c3 = arith.constant 3 : index
    %c0_12 = arith.constant 0 : index
    %32 = vector.load %arg5[%c0_11, %c3, %c0_12] : memref<1x8x128xf32, #tpu.memory_space<vmem>>, vector<1x1x128xf32>
    %33 = vector.shape_cast %32 : vector<1x1x128xf32> to vector<1x128xf32>
    %34 = vector.shape_cast %31 : vector<1x128xf32> to vector<1x1x128xf32>
    tpu.vector_store %arg5[%c0_11, %c3, %c0_12], %34 {strides = array<i32>} : memref<1x8x128xf32, #tpu.memory_space<vmem>>, vector<1x1x128xf32>,
    %c4_i32 = arith.constant 4 : i32
    %35 = arith.addi %2, %c4_i32 : i32
    %36 = arith.index_cast %35 : i32 to index
    %37 = memref.load %arg2[%36] : memref<16xi32, #tpu.memory_space<smem>>
    %38 = arith.index_cast %37 : i32 to index
    %c0_13 = arith.constant 0 : index
    %39 = vector.load %arg3[%38, %c0_13] : memref<64x128xf32, #tpu.memory_space<vmem>>, vector<1x128xf32>
    %c0_14 = arith.constant 0 : index
    %c4 = arith.constant 4 : index
    %c0_15 = arith.constant 0 : index
    %40 = vector.load %arg5[%c0_14, %c4, %c0_15] : memref<1x8x128xf32, #tpu.memory_space<vmem>>, vector<1x1x128xf32>
    %41 = vector.shape_cast %40 : vector<1x1x128xf32> to vector<1x128xf32>
    %42 = vector.shape_cast %39 : vector<1x128xf32> to vector<1x1x128xf32>
    tpu.vector_store %arg5[%c0_14, %c4, %c0_15], %42 {strides = array<i32>} : memref<1x8x128xf32, #tpu.memory_space<vmem>>, vector<1x1x128xf32>,
    %c5_i32 = arith.constant 5 : i32
    %43 = arith.addi %2, %c5_i32 : i32
    %44 = arith.index_cast %43 : i32 to index
    %45 = memref.load %arg2[%44] : memref<16xi32, #tpu.memory_space<smem>>
    %46 = arith.index_cast %45 : i32 to index
    %c0_16 = arith.constant 0 : index
    %47 = vector.load %arg3[%46, %c0_16] : memref<64x128xf32, #tpu.memory_space<vmem>>, vector<1x128xf32>
    %c0_17 = arith.constant 0 : index
    %c5 = arith.constant 5 : index
    %c0_18 = arith.constant 0 : index
    %48 = vector.load %arg5[%c0_17, %c5, %c0_18] : memref<1x8x128xf32, #tpu.memory_space<vmem>>, vector<1x1x128xf32>
    %49 = vector.shape_cast %48 : vector<1x1x128xf32> to vector<1x128xf32>
    %50 = vector.shape_cast %47 : vector<1x128xf32> to vector<1x1x128xf32>
    tpu.vector_store %arg5[%c0_17, %c5, %c0_18], %50 {strides = array<i32>} : memref<1x8x128xf32, #tpu.memory_space<vmem>>, vector<1x1x128xf32>,
    %c6_i32 = arith.constant 6 : i32
    %51 = arith.addi %2, %c6_i32 : i32
    %52 = arith.index_cast %51 : i32 to index
    %53 = memref.load %arg2[%52] : memref<16xi32, #tpu.memory_space<smem>>
    %54 = arith.index_cast %53 : i32 to index
    %c0_19 = arith.constant 0 : index
    %55 = vector.load %arg3[%54, %c0_19] : memref<64x128xf32, #tpu.memory_space<vmem>>, vector<1x128xf32>
    %c0_20 = arith.constant 0 : index
    %c6 = arith.constant 6 : index
    %c0_21 = arith.constant 0 : index
    %56 = vector.load %arg5[%c0_20, %c6, %c0_21] : memref<1x8x128xf32, #tpu.memory_space<vmem>>, vector<1x1x128xf32>
    %57 = vector.shape_cast %56 : vector<1x1x128xf32> to vector<1x128xf32>
    %58 = vector.shape_cast %55 : vector<1x128xf32> to vector<1x1x128xf32>
    tpu.vector_store %arg5[%c0_20, %c6, %c0_21], %58 {strides = array<i32>} : memref<1x8x128xf32, #tpu.memory_space<vmem>>, vector<1x1x128xf32>,
    %c7_i32 = arith.constant 7 : i32
    %59 = arith.addi %2, %c7_i32 : i32
    %60 = arith.index_cast %59 : i32 to index
    %61 = memref.load %arg2[%60] : memref<16xi32, #tpu.memory_space<smem>>
    %62 = arith.index_cast %61 : i32 to index
    %c0_22 = arith.constant 0 : index
    %63 = vector.load %arg3[%62, %c0_22] : memref<64x128xf32, #tpu.memory_space<vmem>>, vector<1x128xf32>
    %c0_23 = arith.constant 0 : index
    %c7 = arith.constant 7 : index
    %c0_24 = arith.constant 0 : index
    %64 = vector.load %arg5[%c0_23, %c7, %c0_24] : memref<1x8x128xf32, #tpu.memory_space<vmem>>, vector<1x1x128xf32>
    %65 = vector.shape_cast %64 : vector<1x1x128xf32> to vector<1x128xf32>
    %66 = vector.shape_cast %63 : vector<1x128xf32> to vector<1x1x128xf32>
    tpu.vector_store %arg5[%c0_23, %c7, %c0_24], %66 {strides = array<i32>} : memref<1x8x128xf32, #tpu.memory_space<vmem>>, vector<1x1x128xf32>,
    %c8_i32_25 = arith.constant 8 : i32
    %67 = arith.muli %arg1, %c8_i32_25 : i32
    %68 = tpu.assume_multiple %67, 8 : i32
    %c0_26 = arith.constant 0 : index
    %c0_27 = arith.constant 0 : index
    %c0_28 = arith.constant 0 : index
    %69 = vector.load %arg5[%c0_26, %c0_27, %c0_28] : memref<1x8x128xf32, #tpu.memory_space<vmem>>, vector<1x8x128xf32>
    %70 = vector.shape_cast %69 : vector<1x8x128xf32> to vector<8x128xf32>
    %71 = arith.index_cast %68 : i32 to index
    %c0_29 = arith.constant 0 : index
    %72 = vector.load %arg4[%71, %c0_29] : memref<16x128xf32, #tpu.memory_space<vmem>>, vector<8x128xf32>
    %73 = arith.addf %70, %72 : vector<8x128xf32>
    %c0_30 = arith.constant 0 : index
    %c0_31 = arith.constant 0 : index
    %c0_32 = arith.constant 0 : index
    %74 = vector.load %arg5[%c0_30, %c0_31, %c0_32] : memref<1x8x128xf32, #tpu.memory_space<vmem>>, vector<1x8x128xf32>
    %75 = vector.shape_cast %74 : vector<1x8x128xf32> to vector<8x128xf32>
    %76 = vector.shape_cast %73 : vector<8x128xf32> to vector<1x8x128xf32>
    tpu.vector_store %arg5[%c0_30, %c0_31, %c0_32], %76 {strides = array<i32>} : memref<1x8x128xf32, #tpu.memory_space<vmem>>, vector<1x8x128xf32>,
    return
  }
  func.func @transform_0(%arg0: i32, %arg1: i32, %arg2: memref<16xi32, #tpu.memory_space<smem>>) -> (i32, i32) {
    %c0_i32 = arith.constant 0 : i32
    %c0_i32_0 = arith.constant 0 : i32
    %c0_i32_1 = arith.constant 0 : i32
    return %c0_i32, %c0_i32_0 : i32, i32
  }
  func.func @transform_1(%arg0: i32, %arg1: i32, %arg2: memref<16xi32, #tpu.memory_space<smem>>) -> (i32, i32) {
    %c0_i32 = arith.constant 0 : i32
    %c0_i32_0 = arith.constant 0 : i32
    %c0_i32_1 = arith.constant 0 : i32
    return %c0_i32, %c0_i32_0 : i32, i32
  }
  func.func @transform_2(%arg0: i32, %arg1: i32, %arg2: memref<16xi32, #tpu.memory_space<smem>>) -> (i32, i32, i32) {
    %c0_i32 = arith.constant 0 : i32
    %c0_i32_0 = arith.constant 0 : i32
    return %arg0, %arg1, %c0_i32 : i32, i32, i32
  }
}

</mosaic_0001>

<bundles_post_ra>
// kernel: tpu_custom_call.1
= control target key start
LH: loop header
LB: loop body
LE: loop exit
PB: predicated region body
PF: predicated region fallthrough
CT: control target
= control target key end

     0   :  { %s808_s0 = inlined_call_operand.hbm [shape: s32[16], index: 0, kind: input, shape index: {}]   ;;  %s809_s1 = inlined_call_operand.hbm [shape: f32[64,128], index: 1, kind: input, shape index: {}]   ;;  %s810_s2 = inlined_call_operand.hbm [shape: f32[16,128], index: 2, kind: input, shape index: {}]   ;;  %s811_s3 = inlined_call_operand.hbm [shape: f32[2,8,128], index: 3, kind: output, shape index: {}]  }
   0x1   :  { %s414_s14 = scalar_lea.hbm %s808_s0, 16 }
   0x2   :  { %p415_p0 = scmp.ne.s32.totalorder %s808_s0, %s414_s14  ;;  %p418_p1 = scmp.lt.u32.totalorder %s414_s14, %s808_s0 }
   0x4   :  { %p420_p2 = pnand %p418_p1, %p415_p0 }
   0x6   :  { %423 = shalt.err (!%p420_p2)  }
   0x7   :  { %s570_s19 = smov [#allocation3]  }
   0x8   :  { %9 = dma.hbm_to_smem %s808_s0, 16, %s570_s19, [#allocation2] }
   0x9   :  { %532 = dma.done.wait [#allocation2], 16 }
   0xa   :  { %533 = vsyncadd [#allocation2], 4294967280 }
   0xb   :  { %11 = sfence }
   0xc   :  { %12 = vsyncpa [#allocation5], 0 }
   0xd   :  { %13 = vsyncpa [#allocation8], 0 }
   0xe   :  { %14 = vsyncpa [#allocation6], 0 }
   0xf   :  { %16 = vsyncpa [#allocation6 + $0x1], 0  ;;  %s608_s22 = smov 0   ;;  %s610_s23 = smov 0  }
  0x10   :  { %s612_s24 = smov 0   ;;  %s614_s25 = smov 0  }
  0x11   :  { %s616_s26 = smov 0   ;;  %s618_s27 = smov 0  }
  0x12 LB: > { %s321_s0 = sadd.s32 4294967295, %s568_s27   ;;  %s322_s28 = sadd.s32 4294967294, %s568_s27   ;;  %s568_s27 = sphi %s618_s27, %s22_s27   ;;  %s564_s26 = sphi %s616_s26, %s829_s26   ;;  %s560_s25 = sphi %s614_s25, %s828_s25   ;;  %s556_s24 = sphi %s612_s24, %s827_s24   ;;  %s552_s23 = sphi %s610_s23, %s826_s23   ;;  %s548_s22 = sphi %s608_s22, %s825_s22  }
  0x13   : > { %s34_s29 = sadd.s32 1, %s564_s26  ;;  %s85_s30 = sadd.s32 1, %s556_s24 }
  0x14   : > { %p36_p3 = scmp.ge.s32.totalorder %s34_s29, 2  ;;  %p95_p4 = scmp.ne.s32.totalorder %s556_s24, %s552_s23 }
  0x15   : > { %p96_p5 = scmp.eq.s32.totalorder %s321_s0, 1  ;;  %p101_p6 = scmp.ne.s32.totalorder %s552_s23, %s548_s22 }
  0x16   : > { %s831_s29 = smov (%p36_p3, %s34_s29), 0  ;;  %p102_p8 = scmp.eq.s32.totalorder %s322_s28, 1 }
  0x17   : > { %p648_p7 = por %p96_p5, %p95_p4  ;;  %s80_s5 = ssub.s32 %s564_s26, %s831_s29 }
  0x18   : > { %p323_p9 = scmp.ge.s32.totalorder %s568_s27, 1  ;;  %p83_p10 = scmp.eq.s32.totalorder %s80_s5, 0 }
  0x19   : > { %s816_s4 = scalar_select %p648_p7, 1, 0 }
  0x1a   : > { %p655_p11 = por %p102_p8, %p101_p6  ;;  %p109_p12 = scmp.lt.s32.totalorder %s568_s27, 3 }
  0x1b   : > { %s661_s7 = scalar_select %p83_p10, %s556_s24, %s85_s30  }
  0x1c   : > { %s817_s6 = scalar_select %p655_p11, 1, 0 }
  0x1d   : > { %p663_p13 = pnand %p323_p9, %p109_p12  ;;  %p667_p0 = scmp.eq.s32.totalorder %s321_s0, 0 }
  0x1e   : > { %s571_s10 = smov [#allocation4]   ;;  %s572_s13 = smov [#allocation7]  }
  0x1f   : > { %s818_s8 = scalar_select %p663_p13, 1, 0 }
  0x20   : > { %s819_s9 = scalar_select %p667_p0, 1, 0 }
  0x21   : > { %p345_p1 = pneg %p663_p13  ;;  %s121_s11 = sshll.u32 %s571_s10, 4  ;;  %s122_s11 = int_to_ptr.vmem [resolvable:$true] %s121_s11 }
  0x22   : > { %s134_s14 = sshll.u32 %s572_s13, 4  ;;  %s424_s17 = scalar_lea.hbm %s809_s1, 1024  ;;  %s679_s14 = int_to_ptr.vmem [resolvable:$true] %s134_s14 }
  0x23   : > { %p675_p2 = pnand %p667_p0, %p345_p1  ;;  %p425_p3 = scmp.ne.s32.totalorder %s809_s1, %s424_s17 }
  0x24   : > { %p431_p8 = scmp.lt.u32.totalorder %s424_s17, %s809_s1 }
  0x25   : > { %p426_p4 = pneg %p675_p2 }
  0x27   : > { %p427_p5 = pnand %p426_p4, %p425_p3 }
  0x29   : > { %p428_p6 = pneg %p427_p5 }
  0x2b   : > { %p433_p9 = pnand %p431_p8, %p428_p6 }
  0x2d   : > { %436 = shalt.err (!%p433_p9)
}
  0x2e   : > { %s437_s0 = scalar_lea.vmem %s122_s11, 1024  ;;  %p445_p11 = scmp.lt.s32.totalorder %s122_s11, %s122_s11 }
  0x2f   : > { %p438_p10 = scmp.ne.s32.totalorder %s122_s11, %s437_s0  ;;  %p446_p7 = scmp.lt.s32.totalorder %s437_s0, %s437_s0 }
  0x31   : > { %p440_p12 = pnand %p438_p10, %p426_p4  ;;  %p447_p0 = por %p446_p7, %p445_p11 }
  0x33   : > { %p441_p1 = pneg %p440_p12 }
  0x35   : > { %p448_p13 = pnand %p447_p0, %p441_p1 }
  0x37   : > { %451 = shalt.err (!%p448_p13)
}
  0x38   : > { %s573_s28 = smov 128   ;;  %s574_s30 = smov 8  }
  0x39   : > { %348 = dma.hbm_to_vmem [thread:$0]  (!%p675_p2), %s809_s1, 1024, %s122_s11, [#allocation5], %s573_s28, %s573_s28, %s574_s30  }
  0x3a   : > { %s452_s16 = scalar_lea.hbm %s810_s2, 256 }
  0x3b   : > { %p453_p3 = scmp.ne.s32.totalorder %s810_s2, %s452_s16  ;;  %p459_p13 = scmp.lt.u32.totalorder %s452_s16, %s810_s2 }
  0x3d   : > { %p455_p7 = pnand %p453_p3, %p426_p4 }
  0x3f   : > { %p456_p11 = pneg %p455_p7 }
  0x41   : > { %p461_p0 = pnand %p459_p13, %p456_p11 }
  0x43   : > { %464 = shalt.err (!%p461_p0)
}
  0x44   : > { %s465_s11 = scalar_lea.vmem %s679_s14, 256  ;;  %p473_p9 = scmp.lt.s32.totalorder %s679_s14, %s679_s14 }
  0x45   : > { %p466_p5 = scmp.ne.s32.totalorder %s679_s14, %s465_s11  ;;  %p474_p10 = scmp.lt.s32.totalorder %s465_s11, %s465_s11 }
  0x47   : > { %p468_p6 = pnand %p466_p5, %p426_p4  ;;  %p475_p12 = por %p474_p10, %p473_p9 }
  0x49   : > { %p469_p8 = pneg %p468_p6 }
  0x4b   : > { %p476_p1 = pnand %p475_p12, %p469_p8 }
  0x4d   : > { %479 = shalt.err (!%p476_p1)
}
  0x4e   : > { %351 = dma.hbm_to_vmem [thread:$0]  (!%p675_p2), %s810_s2, 256, %s679_s14, [#allocation8], %s573_s28, %s573_s28, %s574_s30  }
  0x4f   : > { %p821_p3 = scmp.ne.s32.totalorder %s818_s8, 0 }
  0x50   : > { %p822_p7 = scmp.ne.s32.totalorder (!%p821_p3), %s819_s9, 0 }
  0x51   : > { %150 = sbr.rel (%p821_p3) target bundleno = 133 (0x85), region = 28 }
  0x58   : > { %535 = dma.done.wait (%p822_p7), [#allocation5], 1024  }
  0x59   : > { %537 = vsyncadd (%p822_p7), [#allocation5], 4294966272 }
  0x5a   : > { %539 = dma.done.wait (%p822_p7), [#allocation8], 256  }
  0x5b   : > { %541 = vsyncadd (%p822_p7), [#allocation8], 4294967040  ;;  %s168_s12 = sand.u32 1, %s552_s23   ;;  %s330_s14 = sshll.u32 %s560_s25, 3  ;;  %v215_v8 = vld [vmem:[#allocation7] sm:$0xff] }
  0x5c   : > { %s329_s8 = sshll.u32 %s168_s12, 3  ;;  %s174_s28 = sld [smem:[#allocation3 + %s330_s14]] }
  0x5d   : > { %s178_s30 = sadd.s32 1, %s330_s14  ;;  %s183_s10 = sadd.s32 2, %s330_s14 }
  0x5e   : > { %s179_s5 = sld [smem:[#allocation3 + %s178_s30]]  ;;  %s188_s15 = sadd.s32 3, %s330_s14 }
  0x5f   : > { %s184_s13 = sld [smem:[#allocation3 + %s183_s10]]  ;;  %s193_s17 = sadd.s32 4, %s330_s14 }
  0x60   : > { %s189_s16 = sld [smem:[#allocation3 + %s188_s15]]  ;;  %s198_s19 = sadd.s32 5, %s330_s14 }
  0x61   : > { %s194_s18 = sld [smem:[#allocation3 + %s193_s17]]  ;;  %s203_s11 = sadd.s32 6, %s330_s14 }
  0x62   : > { %s199_s20 = sld [smem:[#allocation3 + %s198_s19]]  ;;  %s175_s9 = scalar_lea.vmem [#allocation4], %s174_s28 }
  0x63   : > { %v176_v0 = vld [vmem:[%s175_s9] sm:$0x1]  ;;  %s208_s21 = sadd.s32 7, %s330_s14  ;;  %s742_s0 = scalar_lea.vmem [#allocation9], %s329_s8 }
  0x64   : > { %177 = vst [vmem:[%s742_s0] sm:$0x1] %v176_v0  ;;  %s204_s30 = sld [smem:[#allocation3 + %s203_s11]]  ;;  %s180_s10 = scalar_lea.vmem [#allocation4], %s179_s5 }
  0x65   : > { %v181_v1 = vld [vmem:[%s180_s10] sm:$0x1]  ;;  %s209_s15 = sld [smem:[#allocation3 + %s208_s21]]  ;;  %s185_s17 = scalar_lea.vmem [#allocation4], %s184_s13 }
  0x66   : > { %182 = vst [vmem:[%s742_s0 + $0x1] sm:$0x1] %v181_v1  ;;  %v186_v2 = vld [vmem:[%s185_s17] sm:$0x1]  ;;  %s190_s14 = scalar_lea.vmem [#allocation4], %s189_s16  ;;  %s332_s16 = sshll.u32 %s560_s25, 7 }
  0x67   : > { %187 = vst [vmem:[%s742_s0 + $0x2] sm:$0x1] %v186_v2  ;;  %v191_v3 = vld [vmem:[%s190_s14] sm:$0x1]  ;;  %s195_s8 = scalar_lea.vmem [#allocation4], %s194_s18  ;;  %s233_s19 = sshll.u32 %s742_s0, 4  ;;  %s760_s19 = int_to_ptr.vmem [resolvable:$true] %s233_s19 }
  0x68   : > { %192 = vst [vmem:[%s742_s0 + $0x3] sm:$0x1] %v191_v3  ;;  %v196_v4 = vld [vmem:[%s195_s8] sm:$0x1]  ;;  %s200_s28 = scalar_lea.vmem [#allocation4], %s199_s20  ;;  %s758_s20 = scalar_lea.hbm %s811_s3, %s332_s16 }
  0x69   : > { %197 = vst [vmem:[%s742_s0 + $0x4] sm:$0x1] %v196_v4  ;;  %v201_v5 = vld [vmem:[%s200_s28] sm:$0x1]  ;;  %s219_s11 = scalar_lea.sflag [#allocation6], %s168_s12  ;;  %s480_s21 = scalar_lea.vmem %s760_s19, 128 }
  0x6a   : > { %202 = vst [vmem:[%s742_s0 + $0x5] sm:$0x1] %v201_v5  ;;  %s205_s5 = scalar_lea.vmem [#allocation4], %s204_s30  ;;  %p481_p2 = scmp.ne.s32.totalorder %s760_s19, %s480_s21 }
  0x6b   : > { %v206_v6 = vld [vmem:[%s205_s5] sm:$0x1]  ;;  %s210_s13 = scalar_lea.vmem [#allocation4], %s209_s15  ;;  %p823_p4 = scmp.ne.s32.totalorder %s816_s4, 0 }
  0x6c   : > { %207 = vst [vmem:[%s742_s0 + $0x6] sm:$0x1] %v206_v6  ;;  %v211_v7 = vld [vmem:[%s210_s13] sm:$0x1]  ;;  %s575_s25 = smov [#allocation9]  }
  0x6d   : > { %212 = vst [vmem:[%s742_s0 + $0x7] sm:$0x1] %v211_v7  ;;  %p482_p11 = pnand %p481_p2, %p823_p4  ;;  %s484_s30 = sshll.u32 %s575_s25, 4  ;;  %s485_s30 = int_to_ptr.vmem [resolvable:$false] %s484_s30 }
  0x6e   : > { %s486_s10 = scalar_lea.vmem %s485_s30, 256  ;;  %p487_p0 = scmp.lt.s32.totalorder %s760_s19, %s485_s30 }
  0x6f   : > { %p483_p13 = pneg %p482_p11  ;;  %p488_p5 = scmp.lt.s32.totalorder %s486_s10, %s480_s21 }
  0x71   : > { %p489_p6 = por %p488_p5, %p487_p0 }
  0x73   : > { %p490_p8 = pnand %p489_p6, %p483_p13 }
  0x74   : > { %v213_v9 = vld [vmem:[%s742_s0] sm:$0xff] }
  0x75   : > { %v216_v10 = vadd.f32 %v215_v8, %v213_v9 }
  0x77   : > { %217 = vst [vmem:[%s742_s0] sm:$0xff] %v216_v10 }
  0x78   : > { %493 = shalt.err (!%p490_p8)
}
  0x79   : > { %s494_s12 = scalar_lea.hbm %s758_s20, 128  ;;  %s498_s17 = scalar_lea.hbm %s811_s3, 256 }
  0x7a   : > { %p495_p9 = scmp.ne.s32.totalorder %s758_s20, %s494_s12  ;;  %p499_p1 = scmp.lt.u32.totalorder %s758_s20, %s811_s3 }
  0x7b   : > { %p500_p3 = scmp.lt.u32.totalorder %s498_s17, %s494_s12  ;;  %p502_p2 = scmp.lt.u32.totalorder %s494_s12, %s758_s20 }
  0x7c   : > { %p496_p10 = pnand %p495_p9, %p823_p4 }
  0x7d   : > { %p501_p7 = por %p500_p3, %p499_p1 }
  0x7e   : > { %p497_p12 = pneg %p496_p10 }
  0x7f   : > { %p503_p11 = por %p502_p2, %p501_p7 }
  0x81   : > { %p504_p13 = pnand %p503_p11, %p497_p12 }
  0x83   : > { %507 = shalt.err (!%p504_p13)
}
  0x84   : > { %343 = dma.vmem_to_hbm [thread:$0]  (%p823_p4), %s760_s19, 128, %s758_s20, %s219_s11  }
  0x85 PF: > { %p360_p0 = scmp.ge.s32.totalorder %s568_s27, 2  ;;  %s245_s28 = sand.u32 1, %s548_s22  }
  0x86   : > { %p824_p5 = scmp.ne.s32.totalorder %s817_s6, 0  ;;  %s246_s5 = scalar_lea.sflag [#allocation6], %s245_s28 }
  0x88   : > { %p353_p6 = pnand %p360_p0, %p824_p5 }
  0x8a   : > { %543 = dma.done.wait (!%p353_p6), %s246_s5, 128  }
  0x8b   : > { %545 = vsyncadd (!%p353_p6), %s246_s5, 4294967168  ;;  %s22_s27 = sadd.s32 1, %s568_s27   ;;  %s825_s22 = smov %s552_s23 }
  0x8c   : > { %p19_p8 = scmp.ge.s32.totalorder %s22_s27, 4   ;;  %s826_s23 = smov %s556_s24 }
  0x8d   : > { %s827_s24 = smov %s661_s7  ;;  %s828_s25 = smov %s564_s26 }
  0x8e   : > { %s829_s26 = smov %s831_s29  ;;  %21 = sbr.rel (!%p19_p8) target bundleno = 18 (0x12), region = 78 }
  0x95   :  { %251 = vsyncpa [#allocation5], 1 }
  0x96   :  { %253 = vsyncpa [#allocation5 + $0x1], 1 }
  0x97   :  { %254 = vsyncpa [#allocation8], 1 }
  0x98   :  { %255 = vsyncpa [#allocation6], 1 }
  0x99   :  { %257 = vsyncpa [#allocation6 + $0x1], 1 }

</bundles_post_ra>
